<compile_context>
chip_gen: v7x
topology: tpu7x:2x2x1
jax: 0.10.0
libtpu: 0.0.40
codegen_flags: <defaults>
</compile_context>

<pallas_src>
import functools
import math

import jax
import jax.numpy as jnp
from jax.experimental import pallas as pl
from jax.experimental.pallas import tpu as pltpu

_LANE = 128


def _focal_kernel(pred_ref, gt_ref, loss_acc_ref, pos_acc_ref, *,
                  block_rows, total_blocks, blocks_per_split, guard_tail):
    s = pl.program_id(0)   # megacore split (parallel)
    i = pl.program_id(1)   # row-block within split (arbitrary / reduction)

    @pl.when(i == 0)
    def _():
        loss_acc_ref[...] = jnp.zeros_like(loss_acc_ref)
        pos_acc_ref[...] = jnp.zeros_like(pos_acc_ref)

    def accumulate():
        pred = pred_ref[...].astype(jnp.float32)
        gt = gt_ref[...].astype(jnp.float32)

        pos = gt == 1.0
        one_minus_pred = 1.0 - pred
        one_minus_gt = 1.0 - gt
        neg_w = one_minus_gt * one_minus_gt
        neg_w = neg_w * neg_w                      # (1 - gt)^4

        # Single log via select.  Assumes gt in [0, 1] (CornerNet heatmaps),
        # so "neg" == "not pos" and no separate neg mask is needed.  Padded
        # elements (pred=0, gt=0) hit the neg branch: log(1)*0 == 0 and add
        # nothing to num_pos.
        #   pos (gt == 1):  log(pred)     * (1 - pred)^2
        #   neg (gt  < 1):  log(1 - pred) * pred^2 * (1 - gt)^4
        x = jnp.where(pos, pred, one_minus_pred)
        w = jnp.where(pos,
                      one_minus_pred * one_minus_pred,
                      pred * pred * neg_w)
        loss_elem = jnp.log(x) * w
        pos_f = pos.astype(jnp.float32)

        # (block_rows, 128) -> (8, 128) partial sums: free reshape + VPU adds.
        g = block_rows // 8
        loss_acc_ref[0] += loss_elem.reshape(g, 8, _LANE).sum(axis=0)
        pos_acc_ref[0] += pos_f.reshape(g, 8, _LANE).sum(axis=0)

    if guard_tail:
        # Last split may see one clamped duplicate block: skip its compute so
        # it is not double-counted (scalar check, no per-element cost).
        pl.when(s * blocks_per_split + i < total_blocks)(accumulate)
    else:
        accumulate()


def _round_up(x, m):
    return ((x + m - 1) // m) * m


@functools.partial(jax.jit, static_argnames=("block_rows",))
def focal_loss(pred, gt, *, block_rows=4096):
    """Pallas implementation of CornerNet focal loss forward.

    pred, gt: same shape (e.g. (B, C, H, W)), pred in (0, 1), gt in [0, 1].
    Returns a scalar f32 loss, matching the PyTorch `_neg_loss` semantics.
    """
    assert pred.shape == gt.shape
    assert block_rows % 16 == 0  # multiple of 16 so bf16 inputs tile too

    n = math.prod(pred.shape)
    n_rows_min = -(-n // _LANE)

    # Choose the row-block size and pad (zeros) so the grid is exact: no
    # partial blocks, no per-element masking in the kernel.
    if n_rows_min <= block_rows:
        br = _round_up(max(n_rows_min, 1), 16)
        total_blocks = 1
    else:
        br = block_rows
        total_blocks = -(-n_rows_min // br)
    n_rows = total_blocks * br
    padded = n_rows * _LANE

    pred_f = pred.reshape(-1)
    gt_f = gt.reshape(-1)
    if padded != n:
        # Zero pad: pred=0 / gt=0 contributes exactly 0 to loss and num_pos.
        pred_f = jnp.pad(pred_f, (0, padded - n))
        gt_f = jnp.pad(gt_f, (0, padded - n))
    pred2 = pred_f.reshape(n_rows, _LANE)
    gt2 = gt_f.reshape(n_rows, _LANE)

    # Megacore split (v7x): size-2 parallel leading axis when there is work.
    n_splits = 2 if total_blocks >= 2 else 1
    bps = -(-total_blocks // n_splits)
    has_duplicate = (n_splits * bps) != total_blocks
    grid = (n_splits, bps)

    if has_duplicate:
        # Clamp so the (single) duplicate tail block never DMAs out of bounds;
        # its contribution is skipped by the in-kernel scalar guard.
        def in_map(s, i):
            return (jnp.minimum(s * bps + i, total_blocks - 1), 0)
    else:
        def in_map(s, i):
            return (s * bps + i, 0)

    def out_map(s, i):
        return (s, 0, 0)

    kernel = functools.partial(
        _focal_kernel, block_rows=br, total_blocks=total_blocks,
        blocks_per_split=bps, guard_tail=has_duplicate)

    bytes_accessed = (padded * (pred.dtype.itemsize + gt.dtype.itemsize)
                      + 2 * n_splits * 8 * _LANE * 4)
    cost = pl.CostEstimate(flops=25 * padded, transcendentals=padded,
                           bytes_accessed=bytes_accessed)

    loss_acc, pos_acc = pl.pallas_call(
        kernel,
        out_shape=(
            jax.ShapeDtypeStruct((n_splits, 8, _LANE), jnp.float32),
            jax.ShapeDtypeStruct((n_splits, 8, _LANE), jnp.float32),
        ),
        grid_spec=pltpu.PrefetchScalarGridSpec(
            num_scalar_prefetch=0,
            grid=grid,
            in_specs=[
                pl.BlockSpec((br, _LANE), in_map),
                pl.BlockSpec((br, _LANE), in_map),
            ],
            out_specs=[
                pl.BlockSpec((1, 8, _LANE), out_map),
                pl.BlockSpec((1, 8, _LANE), out_map),
            ],
        ),
        compiler_params=pltpu.CompilerParams(
            dimension_semantics=("parallel", "arbitrary"),
        ),
        cost_estimate=cost,
    )(pred2, gt2)

    loss_sum = jnp.sum(loss_acc)
    num_pos = jnp.sum(pos_acc)
    # When num_pos == 0 the pos part of loss_sum is 0, so this already equals
    # -neg_loss_sum: no branch needed.
    return -loss_sum / jnp.maximum(num_pos, 1.0)


def _focal_loss_ref(pred, gt):
    """Pure-JAX reference matching the PyTorch _neg_loss exactly."""
    pred = pred.astype(jnp.float32)
    gt = gt.astype(jnp.float32)
    pos_inds = (gt == 1.0).astype(jnp.float32)
    neg_inds = (gt < 1.0).astype(jnp.float32)
    neg_weights = jnp.power(1.0 - gt, 4)
    pos_loss = jnp.log(pred) * jnp.power(1.0 - pred, 2) * pos_inds
    neg_loss = jnp.log(1.0 - pred) * jnp.power(pred, 2) * neg_weights * neg_inds
    num_pos = pos_inds.sum()
    pos_loss = pos_loss.sum()
    neg_loss = neg_loss.sum()
    return jnp.where(num_pos == 0.0,
                     -neg_loss,
                     -(pos_loss + neg_loss) / jnp.maximum(num_pos, 1.0))


if __name__ == "__main__":
    # FocalLoss has no learnable parameters; only inputs are needed.
    key = jax.random.PRNGKey(0)
    k_pred, k_gt, k_pos = jax.random.split(key, 3)

    B, C, H, W = 2, 4, 16, 16  # pred/gt: (batch, channels, height, width)

    # pred: heatmap predictions in (0, 1)
    pred = jax.nn.sigmoid(jax.random.normal(k_pred, (B, C, H, W), jnp.float32))
    pred = jnp.clip(pred, 1e-4, 1.0 - 1e-4)

    # gt: gaussian-splatted ground-truth heatmap in [0, 1] with a few exact 1s
    gt = jax.random.uniform(k_gt, (B, C, H, W), jnp.float32, 0.0, 0.99)
    peak_mask = jax.random.uniform(k_pos, (B, C, H, W)) < 0.02
    gt = jnp.where(peak_mask, 1.0, gt)

    loss = focal_loss(pred, gt)
    loss = jax.block_until_ready(loss)

    ref = _focal_loss_ref(pred, gt)
    assert jnp.allclose(loss, ref, rtol=1e-5, atol=1e-5), (loss, ref)

    print("KERNEL_OK")
</pallas_src>

<mosaic_0001>
module attributes {stable_mosaic.version = 11 : i64} {
  func.func @_focal_kernel(%arg0: i32, %arg1: i32, %arg2: memref<16x128xf32, #tpu.memory_space<vmem>>, %arg3: memref<16x128xf32, #tpu.memory_space<vmem>>, %arg4: memref<1x8x128xf32, #tpu.memory_space<vmem>>, %arg5: memref<1x8x128xf32, #tpu.memory_space<vmem>>) attributes {dimension_semantics = [#tpu.dimension_semantics<parallel>, #tpu.dimension_semantics<arbitrary>], iteration_bounds = array<i64: 1, 1>, scalar_prefetch = 0 : i64, scratch_operands = 0 : i64, tpu.core_type = #tpu.core_type<tc>, window_params = [{transform_indices = @transform_0, window_bounds = array<i64: 16, 128>}, {transform_indices = @transform_1, window_bounds = array<i64: 16, 128>}, {transform_indices = @transform_2, window_bounds = array<i64: 1, 8, 128>}, {transform_indices = @transform_3, window_bounds = array<i64: 1, 8, 128>}]} {
    %c0_i32 = arith.constant 0 : i32
    %0 = arith.cmpi eq, %arg1, %c0_i32 : i32
    %1 = arith.extui %0 : i1 to i32
    %c0_i32_0 = arith.constant 0 : i32
    %2 = arith.cmpi ne, %1, %c0_i32_0 : i32
    scf.if %2 {
      %cst_20 = arith.constant 0.000000e+00 : f32
      %38 = vector.broadcast %cst_20 : f32 to vector<1x8x128xf32>
      %c0_21 = arith.constant 0 : index
      %c0_22 = arith.constant 0 : index
      %c0_23 = arith.constant 0 : index
      %39 = vector.load %arg4[%c0_21, %c0_22, %c0_23] : memref<1x8x128xf32, #tpu.memory_space<vmem>>, vector<1x8x128xf32>
      tpu.vector_store %arg4[%c0_21, %c0_22, %c0_23], %38 {strides = array<i32>} : memref<1x8x128xf32, #tpu.memory_space<vmem>>, vector<1x8x128xf32>,
      %cst_24 = arith.constant 0.000000e+00 : f32
      %40 = vector.broadcast %cst_24 : f32 to vector<1x8x128xf32>
      %c0_25 = arith.constant 0 : index
      %c0_26 = arith.constant 0 : index
      %c0_27 = arith.constant 0 : index
      %41 = vector.load %arg5[%c0_25, %c0_26, %c0_27] : memref<1x8x128xf32, #tpu.memory_space<vmem>>, vector<1x8x128xf32>
      tpu.vector_store %arg5[%c0_25, %c0_26, %c0_27], %40 {strides = array<i32>} : memref<1x8x128xf32, #tpu.memory_space<vmem>>, vector<1x8x128xf32>,
    } else {
    }
    %c0 = arith.constant 0 : index
    %c0_1 = arith.constant 0 : index
    %3 = vector.load %arg2[%c0, %c0_1] : memref<16x128xf32, #tpu.memory_space<vmem>>, vector<16x128xf32>
    %c0_2 = arith.constant 0 : index
    %c0_3 = arith.constant 0 : index
    %4 = vector.load %arg3[%c0_2, %c0_3] : memref<16x128xf32, #tpu.memory_space<vmem>>, vector<16x128xf32>
    %cst = arith.constant 1.000000e+00 : f32
    %5 = vector.broadcast %cst : f32 to vector<16x128xf32>
    %6 = arith.cmpf oeq, %4, %5 : vector<16x128xf32>
    %cst_4 = arith.constant 1.000000e+00 : f32
    %7 = vector.broadcast %cst_4 : f32 to vector<16x128xf32>
    %8 = arith.subf %7, %3 : vector<16x128xf32>
    %cst_5 = arith.constant 1.000000e+00 : f32
    %9 = vector.broadcast %cst_5 : f32 to vector<16x128xf32>
    %10 = arith.subf %9, %4 : vector<16x128xf32>
    %11 = arith.mulf %10, %10 : vector<16x128xf32>
    %12 = arith.mulf %11, %11 : vector<16x128xf32>
    %13 = arith.select %6, %3, %8 : vector<16x128xi1>, vector<16x128xf32>
    %14 = arith.mulf %8, %8 : vector<16x128xf32>
    %15 = arith.mulf %3, %3 : vector<16x128xf32>
    %16 = arith.mulf %15, %12 : vector<16x128xf32>
    %17 = arith.select %6, %14, %16 : vector<16x128xi1>, vector<16x128xf32>
    %18 = math.log %13 : vector<16x128xf32>
    %19 = arith.mulf %18, %17 : vector<16x128xf32>
    %20 = arith.extui %6 : vector<16x128xi1> to vector<16x128xi32>
    %21 = arith.sitofp %20 : vector<16x128xi32> to vector<16x128xf32>
    %c0_6 = arith.constant 0 : index
    %c0_7 = arith.constant 0 : index
    %c0_8 = arith.constant 0 : index
    %22 = vector.load %arg4[%c0_6, %c0_7, %c0_8] : memref<1x8x128xf32, #tpu.memory_space<vmem>>, vector<1x8x128xf32>
    %23 = vector.shape_cast %22 : vector<1x8x128xf32> to vector<8x128xf32>
    %24 = vector.shape_cast %19 : vector<16x128xf32> to vector<2x8x128xf32>
    %cst_9 = arith.constant dense<0.000000e+00> : vector<8x128xf32>
    %25 = vector.multi_reduction <add>, %24, %cst_9 [0] : vector<2x8x128xf32> to vector<8x128xf32>
    %26 = arith.addf %23, %25 : vector<8x128xf32>
    %c0_10 = arith.constant 0 : index
    %c0_11 = arith.constant 0 : index
    %c0_12 = arith.constant 0 : index
    %27 = vector.load %arg4[%c0_10, %c0_11, %c0_12] : memref<1x8x128xf32, #tpu.memory_space<vmem>>, vector<1x8x128xf32>
    %28 = vector.shape_cast %27 : vector<1x8x128xf32> to vector<8x128xf32>
    %29 = vector.shape_cast %26 : vector<8x128xf32> to vector<1x8x128xf32>
    tpu.vector_store %arg4[%c0_10, %c0_11, %c0_12], %29 {strides = array<i32>} : memref<1x8x128xf32, #tpu.memory_space<vmem>>, vector<1x8x128xf32>,
    %c0_13 = arith.constant 0 : index
    %c0_14 = arith.constant 0 : index
    %c0_15 = arith.constant 0 : index
    %30 = vector.load %arg5[%c0_13, %c0_14, %c0_15] : memref<1x8x128xf32, #tpu.memory_space<vmem>>, vector<1x8x128xf32>
    %31 = vector.shape_cast %30 : vector<1x8x128xf32> to vector<8x128xf32>
    %32 = vector.shape_cast %21 : vector<16x128xf32> to vector<2x8x128xf32>
    %cst_16 = arith.constant dense<0.000000e+00> : vector<8x128xf32>
    %33 = vector.multi_reduction <add>, %32, %cst_16 [0] : vector<2x8x128xf32> to vector<8x128xf32>
    %34 = arith.addf %31, %33 : vector<8x128xf32>
    %c0_17 = arith.constant 0 : index
    %c0_18 = arith.constant 0 : index
    %c0_19 = arith.constant 0 : index
    %35 = vector.load %arg5[%c0_17, %c0_18, %c0_19] : memref<1x8x128xf32, #tpu.memory_space<vmem>>, vector<1x8x128xf32>
    %36 = vector.shape_cast %35 : vector<1x8x128xf32> to vector<8x128xf32>
    %37 = vector.shape_cast %34 : vector<8x128xf32> to vector<1x8x128xf32>
    tpu.vector_store %arg5[%c0_17, %c0_18, %c0_19], %37 {strides = array<i32>} : memref<1x8x128xf32, #tpu.memory_space<vmem>>, vector<1x8x128xf32>,
    return
  }
  func.func @transform_0(%arg0: i32, %arg1: i32) -> (i32, i32) {
    %c1_i32 = arith.constant 1 : i32
    %0 = arith.muli %arg0, %c1_i32 : i32
    %1 = arith.addi %0, %arg1 : i32
    %c0_i32 = arith.constant 0 : i32
    %c0_i32_0 = arith.constant 0 : i32
    return %1, %c0_i32 : i32, i32
  }
  func.func @transform_1(%arg0: i32, %arg1: i32) -> (i32, i32) {
    %c1_i32 = arith.constant 1 : i32
    %0 = arith.muli %arg0, %c1_i32 : i32
    %1 = arith.addi %0, %arg1 : i32
    %c0_i32 = arith.constant 0 : i32
    %c0_i32_0 = arith.constant 0 : i32
    return %1, %c0_i32 : i32, i32
  }
  func.func @transform_2(%arg0: i32, %arg1: i32) -> (i32, i32, i32) {
    %c0_i32 = arith.constant 0 : i32
    %c0_i32_0 = arith.constant 0 : i32
    %c0_i32_1 = arith.constant 0 : i32
    return %arg0, %c0_i32, %c0_i32_0 : i32, i32, i32
  }
  func.func @transform_3(%arg0: i32, %arg1: i32) -> (i32, i32, i32) {
    %c0_i32 = arith.constant 0 : i32
    %c0_i32_0 = arith.constant 0 : i32
    %c0_i32_1 = arith.constant 0 : i32
    return %arg0, %c0_i32, %c0_i32_0 : i32, i32, i32
  }
}

</mosaic_0001>

<bundles_post_ra>
// kernel: focal_loss.1
= control target key start
LH: loop header
LB: loop body
LE: loop exit
PB: predicated region body
PF: predicated region fallthrough
CT: control target
= control target key end

     0   :  { %v132_v12 = vmov 0.0   ;;  %s177_s0 = inlined_call_operand.vmem [shape: f32[16,128], index: 0, kind: input, shape index: {}]   ;;  %s178_s1 = inlined_call_operand.vmem [shape: f32[16,128], index: 1, kind: input, shape index: {}]   ;;  %s179_s3 = inlined_call_operand.vmem [shape: f32[1,8,128], index: 3, kind: output, shape index: {1}]   ;;  %s180_s2 = inlined_call_operand.vmem [shape: f32[1,8,128], index: 2, kind: output, shape index: {0}]  }
   0x1   :  { %v63_v0 = vld [vmem:[%s177_s0] sm:$0xff]  ;;  %v64_v1 = vld [vmem:[%s177_s0 + $0x8] sm:$0xff] }
   0x2   :  { %v65_v2 = vld [vmem:[%s178_s1] sm:$0xff]  ;;  %v66_v3 = vld [vmem:[%s178_s1 + $0x8] sm:$0xff]  ;;  %v69_v4 = vsub.f32 1.0, %v63_v0  ;;  %v70_v5 = vsub.f32 1.0, %v64_v1  ;;  %v81_v16 = vmul.f32 %v63_v0, %v63_v0  ;;  %v82_v19 = vmul.f32 %v64_v1, %v64_v1 }
   0x3   :  { %vm67_vm0 = vcmp.eq.f32.partialorder %v65_v2, 1.0  ;;  %v71_v6 = vsub.f32 1.0, %v65_v2  ;;  %vm68_vm1 = vcmp.eq.f32.partialorder %v66_v3, 1.0  ;;  %v72_v7 = vsub.f32 1.0, %v66_v3 }
   0x4   :  { %v77_v9 = vsel %vm67_vm0, %v63_v0, %v69_v4  ;;  %v78_v10 = vsel %vm68_vm1, %v64_v1, %v70_v5  ;;  %v125_v13 = vsel %vm67_vm0, 1.0, %v132_v12  ;;  %v126_v14 = vsel %vm68_vm1, 1.0, %v132_v12 }
   0x5   :  { %v73_v8 = vmul.f32 %v71_v6, %v71_v6  ;;  %v74_v11 = vmul.f32 %v72_v7, %v72_v7  ;;  %128 = vlog2.f32 %v77_v9  ;;  %v102_v17 = vadd.f32 %v126_v14, %v125_v13 }
   0x6   :  { %130 = vlog2.f32 %v78_v10  ;;  %v79_v20 = vmul.f32 %v69_v4, %v69_v4  ;;  %v80_v22 = vmul.f32 %v70_v5, %v70_v5 }
   0x7   :  { %v75_v15 = vmul.f32 %v73_v8, %v73_v8  ;;  %v76_v18 = vmul.f32 %v74_v11, %v74_v11  ;;  %104 = vst [vmem:[%s179_s3] sm:$0xff] %v102_v17 }
   0x9   :  { %v83_v21 = vmul.f32 %v81_v16, %v75_v15  ;;  %v84_v23 = vmul.f32 %v82_v19, %v76_v18 }
   0xb   :  { %v85_v25 = vsel %vm67_vm0, %v79_v20, %v83_v21  ;;  %v86_v27 = vsel %vm68_vm1, %v80_v22, %v84_v23 }
   0xf   :  { %v129_v24 = vpop.eup %128 }
  0x10   :  { %v131_v26 = vpop.eup %130  ;;  %v88_v28 = vmul.f32 0.6931472, %v129_v24 }
  0x11   :  { %v90_v29 = vmul.f32 0.6931472, %v131_v26 }
  0x12   :  { %v91_v30 = vmul.f32 %v88_v28, %v85_v25 }
  0x13   :  { %v92_v31 = vmul.f32 %v90_v29, %v86_v27 }
  0x15   :  { %v98_v32 = vadd.f32 %v92_v31, %v91_v30 }
  0x17   :  { %100 = vst [vmem:[%s180_s2] sm:$0xff] %v98_v32 }

</bundles_post_ra>
